<compile_context>
chip_gen: v5e
topology: v5e:2x2
jax: 0.10.0
libtpu: 0.0.40
codegen_flags: <defaults>
</compile_context>

<pallas_src>
import math

import jax
import jax.numpy as jnp
from jax import lax
from jax.experimental import pallas as pl
from jax.experimental.pallas import tpu as pltpu

# Model dims.
B_DEMO, F_FEAT, C_CAT, H_DIM, L_DIM = 2, 16, 8, 32, 4
FC = F_FEAT * C_CAT                       # 128 -> lane-dense decoder output
LOG_2PI = math.log(2.0 * math.pi)
LOG_CLIP_LO = math.log(1e-15)
LOG_CLIP_HI = math.log(1.0 - 1e-15)

# ---- packed parameter slab layout (single f32 [264, 128] buffer) ----------
# Every block / bias row starts on an 8-row (sublane) boundary.
E1W, E1B = 0, 16          # enc layer1 : W[16,32] rows 0..15, bias row 16, cols 0:32
EHW, EHB = 24, 56         # enc heads  : [Wmu|Wlv][32,8] rows 24..55, bias row 56, cols 0:8
D1W, D1B = 64, 72         # dec layer1 : W[4,32] rows 64..67, bias row 72, cols 0:32
D2W, D2B = 80, 112        # dec layer2 : W[32,128] rows 80..111, bias row 112
PT0 = 120                 # P^T [16,128]  (group-id one-hot, transposed)
P0 = 136                  # P   [128,16]  (lane j belongs to group j // C_CAT)
SLAB_ROWS = 264


def vae_elbo_kernel(x_ref, eps_ref, slab_ref, out_ref):
    # ---------------- encoder_nn ----------------
    xf = x_ref[...].astype(jnp.float32)                                # [tb, F]
    h_e = jnp.tanh(
        jnp.dot(xf, slab_ref[E1W:E1W + F_FEAT, 0:H_DIM],
                preferred_element_type=jnp.float32)
        + slab_ref[E1B:E1B + 1, 0:H_DIM])                              # [tb, H]
    heads = (jnp.dot(h_e, slab_ref[EHW:EHW + H_DIM, 0:2 * L_DIM],
                     preferred_element_type=jnp.float32)
             + slab_ref[EHB:EHB + 1, 0:2 * L_DIM])                     # [tb, 2L]
    z_mu = heads[:, 0:L_DIM]
    z_log_var = heads[:, L_DIM:2 * L_DIM]

    # ---------------- reparameterize (Encoder.sample) ----------------
    z = z_mu + jnp.exp(0.5 * z_log_var) * eps_ref[...]                 # [tb, L]

    # ---------------- decoder_nn (categorical head, lane-dense) ----------------
    h_d = jnp.tanh(
        jnp.dot(z, slab_ref[D1W:D1W + L_DIM, 0:H_DIM],
                preferred_element_type=jnp.float32)
        + slab_ref[D1B:D1B + 1, 0:H_DIM])                              # [tb, H]
    logits = (jnp.dot(h_d, slab_ref[D2W:D2W + H_DIM, :],
                      preferred_element_type=jnp.float32)
              + slab_ref[D2B:D2B + 1, :])                              # [tb, F*C]

    # Softmax over each contiguous group of C_CAT lanes (PyTorch dim=2) WITHOUT
    # a lane-destroying [tb,F,C] reshape.  Per-row max is constant within every
    # group, so the shift is softmax-invariant.  Group exp-sums are gathered to
    # a [tb,F] tile with a 0/1 matmul (P), logged there (8x fewer log()s), and
    # broadcast back lane-dense with P^T (both matrices exact in f32).
    rmax = jnp.max(logits, axis=-1, keepdims=True)                     # [tb, 1]
    shifted = logits - rmax
    e = jnp.exp(shifted)                                               # [tb, F*C]
    gs = jnp.dot(e, slab_ref[P0:P0 + FC, 0:F_FEAT],
                 preferred_element_type=jnp.float32)                   # [tb, F]
    log_gs = jnp.dot(jnp.log(gs), slab_ref[PT0:PT0 + F_FEAT, :],
                     preferred_element_type=jnp.float32)               # [tb, F*C]
    # log(clamp(softmax, 1e-15, 1-1e-15)) == clip(log_softmax, log bounds)
    log_p = jnp.clip(shifted - log_gs, LOG_CLIP_LO, LOG_CLIP_HI)
    # TODO(synk): Decoder.decode() asserts allclose(softmax, ones) (only true when
    # num_categories == 1); the assert is skipped, value path unchanged.

    # Per-tile partial sums; the exact algebraic collapse of the reference's
    # one_hot * log(probs).sum() recon term and Gaussian terms is finished in
    # the wrapper from these three scalars.
    p_logp = jnp.sum(log_p)                                            # sum log p
    p_q = jnp.sum(0.5 * L_DIM * z_log_var + 0.5 * z_mu * z_mu)         # encoder term
    p_z = jnp.sum(0.5 * z * z)                                         # prior term

    lane = lax.broadcasted_iota(jnp.int32, (1, 1, FC), 2)
    out_ref[...] = (jnp.where(lane == 0, p_logp, 0.0)
                    + jnp.where(lane == 1, p_q, 0.0)
                    + jnp.where(lane == 2, p_z, 0.0))


def _batch_tile(batch):
    # Largest multiple-of-8 tile (capped at 2048) that divides the batch: fewer
    # grid steps amortize the ~0.35us/step overhead and partial-sum writebacks.
    # TODO(synk): on v7x prefer keeping n_tiles a multiple of 2 so the
    # "parallel" grid axis shards across both TensorCores; single-TC v5e/v6e
    # strictly prefer one big tile.
    for tb in (2048, 1024, 512, 256, 128, 64, 32, 16, 8):
        if batch % tb == 0:
            return tb
    return batch                      # tiny batches run as a single tile


def vae_forward(x_int, eps, slab):
    batch = x_int.shape[0]
    tb = _batch_tile(batch)
    n_tiles = batch // tb

    partials = pl.pallas_call(
        vae_elbo_kernel,
        out_shape=jax.ShapeDtypeStruct((n_tiles, 1, FC), jnp.float32),
        grid_spec=pltpu.PrefetchScalarGridSpec(
            num_scalar_prefetch=0,
            grid=(n_tiles,),
            in_specs=[
                pl.BlockSpec((tb, F_FEAT), lambda i: (i, 0)),
                pl.BlockSpec((tb, L_DIM), lambda i: (i, 0)),
                pl.BlockSpec((SLAB_ROWS, FC), lambda i: (0, 0)),   # weights resident
            ],
            out_specs=pl.BlockSpec((1, 1, FC), lambda i: (i, 0, 0)),
        ),
        compiler_params=pltpu.CompilerParams(
            dimension_semantics=("parallel",)),
    )(x_int, eps, slab)

    p_logp = jnp.sum(partials[:, 0, 0])
    p_q = jnp.sum(partials[:, 0, 1])
    p_z = jnp.sum(partials[:, 0, 2])

    # Encoder.get_log_likelihood: sum over [B,L] of
    #   (-0.5*L*log2pi - 0.5*L*logvar - 0.5*mu^2)   (constant appears B*L times)
    log_q = -0.5 * L_DIM * LOG_2PI * (batch * L_DIM) - p_q
    # StandardPrior.get_log_likelihood: constant added exactly once, minus sum(0.5*z^2)
    log_pz = -0.5 * L_DIM * LOG_2PI - p_z
    kl = log_q - log_pz
    # Recon collapse: mean(one_hot * sum(log p) - kl) == sum(log p)/C_CAT - kl
    # (exactly one '1' per (b, f) row; one-hot width pinned to C_CAT).
    elbo_loss = kl - p_logp / C_CAT
    return elbo_loss.astype(jnp.float32)


def init_params(key):
    ks = jax.random.split(key, 4)
    s = 0.1
    we1 = jax.random.normal(ks[0], (F_FEAT, H_DIM), jnp.float32) * s
    be1 = jnp.zeros((1, H_DIM), jnp.float32)
    wmu = jax.random.normal(ks[1], (H_DIM, L_DIM), jnp.float32) * s
    bmu = jnp.zeros((1, L_DIM), jnp.float32)
    wlv = jax.random.normal(ks[2], (H_DIM, L_DIM), jnp.float32) * s
    blv = jnp.zeros((1, L_DIM), jnp.float32)
    wd1 = jax.random.normal(ks[3], (L_DIM, H_DIM), jnp.float32) * s
    bd1 = jnp.zeros((1, H_DIM), jnp.float32)
    wd2 = jax.random.normal(jax.random.fold_in(key, 7),
                            (H_DIM, F_FEAT * C_CAT), jnp.float32) * s
    bd2 = jnp.zeros((1, F_FEAT * C_CAT), jnp.float32)
    return (we1, be1, wmu, bmu, wlv, blv, wd1, bd1, wd2, bd2)


def pack_params(params):
    """Pack all weights/biases + the group-sum factors P / P^T into one f32 slab."""
    we1, be1, wmu, bmu, wlv, blv, wd1, bd1, wd2, bd2 = params
    slab = jnp.zeros((SLAB_ROWS, FC), jnp.float32)
    slab = slab.at[E1W:E1W + F_FEAT, 0:H_DIM].set(we1)
    slab = slab.at[E1B, 0:H_DIM].set(be1.reshape(-1))
    slab = slab.at[EHW:EHW + H_DIM, 0:L_DIM].set(wmu)
    slab = slab.at[EHW:EHW + H_DIM, L_DIM:2 * L_DIM].set(wlv)
    slab = slab.at[EHB, 0:L_DIM].set(bmu.reshape(-1))
    slab = slab.at[EHB, L_DIM:2 * L_DIM].set(blv.reshape(-1))
    slab = slab.at[D1W:D1W + L_DIM, 0:H_DIM].set(wd1)
    slab = slab.at[D1B, 0:H_DIM].set(bd1.reshape(-1))
    slab = slab.at[D2W:D2W + H_DIM, :].set(wd2)
    slab = slab.at[D2B, :].set(bd2.reshape(-1))
    # P[j, f] = 1 iff lane j belongs to feature group f (contiguous C_CAT lanes).
    gid = jnp.arange(FC) // C_CAT
    pmat = (gid[:, None] == jnp.arange(F_FEAT)[None, :]).astype(jnp.float32)
    slab = slab.at[PT0:PT0 + F_FEAT, :].set(pmat.T)
    slab = slab.at[P0:P0 + FC, 0:F_FEAT].set(pmat)
    return slab


if __name__ == "__main__":
    key = jax.random.PRNGKey(0)
    k_p, k_x, k_e = jax.random.split(key, 3)

    params = init_params(k_p)
    slab = pack_params(params)

    # categorical data: integer categories in [0, C_CAT)
    x = jax.random.randint(k_x, (B_DEMO, F_FEAT), 0, C_CAT, dtype=jnp.int32)
    # F.one_hot(x) uses a data-dependent width (max+1); pin it to C_CAT deterministically.
    x = x.at[0, 0].set(C_CAT - 1)
    # torch.randn_like reparameterization noise -> deterministic epsilon input
    eps = jax.random.normal(k_e, (B_DEMO, L_DIM), jnp.float32)

    loss = jax.jit(vae_forward)(x, eps, slab)
    jax.block_until_ready(loss)
    assert loss.shape == () and loss.dtype == jnp.float32
    print("KERNEL_OK")
</pallas_src>

<mosaic_0001>
module attributes {stable_mosaic.version = 11 : i64} {
  func.func @vae_elbo_kernel(%arg0: i32, %arg1: memref<2x16xi32, #tpu.memory_space<vmem>>, %arg2: memref<2x4xf32, #tpu.memory_space<vmem>>, %arg3: memref<264x128xf32, #tpu.memory_space<vmem>>, %arg4: memref<1x1x128xf32, #tpu.memory_space<vmem>>) attributes {dimension_semantics = [#tpu.dimension_semantics<parallel>], iteration_bounds = array<i64: 1>, scalar_prefetch = 0 : i64, scratch_operands = 0 : i64, tpu.core_type = #tpu.core_type<tc>, window_params = [{transform_indices = @transform_0, window_bounds = array<i64: 2, 16>}, {transform_indices = @transform_1, window_bounds = array<i64: 2, 4>}, {pipeline_mode = #tpu.pipeline_mode<synchronous>, transform_indices = @transform_2, window_bounds = array<i64: 264, 128>}, {transform_indices = @transform_3, window_bounds = array<i64: 1, 1, 128>}]} {
    %c0 = arith.constant 0 : index
    %c0_0 = arith.constant 0 : index
    %0 = vector.load %arg1[%c0, %c0_0] : memref<2x16xi32, #tpu.memory_space<vmem>>, vector<2x16xi32>
    %1 = arith.sitofp %0 : vector<2x16xi32> to vector<2x16xf32>
    %c0_1 = arith.constant 0 : index
    %c0_2 = arith.constant 0 : index
    %2 = vector.load %arg3[%c0_1, %c0_2] : memref<264x128xf32, #tpu.memory_space<vmem>>, vector<16x32xf32>
    %cst = arith.constant dense<0.000000e+00> : vector<2x32xf32>
    %3 = tpu.matmul %1, %2, %cst {dimension_numbers = #tpu.dot_dimension_numbers<[1], [0], [0], [1], [0, 0, 1, 1], [], []>} : vector<2x16xf32>, vector<16x32xf32>, vector<2x32xf32> -> vector<2x32xf32>
    %c16 = arith.constant 16 : index
    %c0_3 = arith.constant 0 : index
    %4 = vector.load %arg3[%c16, %c0_3] : memref<264x128xf32, #tpu.memory_space<vmem>>, vector<1x32xf32>
    %5 = vector.broadcast %4 : vector<1x32xf32> to vector<2x32xf32>
    %6 = arith.addf %3, %5 : vector<2x32xf32>
    %7 = math.tanh %6 : vector<2x32xf32>
    %c24 = arith.constant 24 : index
    %c0_4 = arith.constant 0 : index
    %8 = vector.load %arg3[%c24, %c0_4] : memref<264x128xf32, #tpu.memory_space<vmem>>, vector<32x8xf32>
    %cst_5 = arith.constant dense<0.000000e+00> : vector<2x8xf32>
    %9 = tpu.matmul %7, %8, %cst_5 {dimension_numbers = #tpu.dot_dimension_numbers<[1], [0], [0], [1], [0, 0, 1, 1], [], []>} : vector<2x32xf32>, vector<32x8xf32>, vector<2x8xf32> -> vector<2x8xf32>
    %c56 = arith.constant 56 : index
    %c0_6 = arith.constant 0 : index
    %10 = vector.load %arg3[%c56, %c0_6] : memref<264x128xf32, #tpu.memory_space<vmem>>, vector<1x8xf32>
    %11 = vector.broadcast %10 : vector<1x8xf32> to vector<2x8xf32>
    %12 = arith.addf %9, %11 : vector<2x8xf32>
    %13 = vector.extract_strided_slice %12 {offsets = [0, 0], sizes = [2, 4], strides = [1, 1]} : vector<2x8xf32> to vector<2x4xf32>
    %14 = vector.extract_strided_slice %12 {offsets = [0, 4], sizes = [2, 4], strides = [1, 1]} : vector<2x8xf32> to vector<2x4xf32>
    %cst_7 = arith.constant 5.000000e-01 : f32
    %15 = vector.broadcast %cst_7 : f32 to vector<2x4xf32>
    %16 = arith.mulf %15, %14 : vector<2x4xf32>
    %17 = math.exp %16 : vector<2x4xf32>
    %c0_8 = arith.constant 0 : index
    %c0_9 = arith.constant 0 : index
    %18 = vector.load %arg2[%c0_8, %c0_9] : memref<2x4xf32, #tpu.memory_space<vmem>>, vector<2x4xf32>
    %19 = arith.mulf %17, %18 : vector<2x4xf32>
    %20 = arith.addf %13, %19 : vector<2x4xf32>
    %c64 = arith.constant 64 : index
    %c0_10 = arith.constant 0 : index
    %21 = vector.load %arg3[%c64, %c0_10] : memref<264x128xf32, #tpu.memory_space<vmem>>, vector<4x32xf32>
    %cst_11 = arith.constant dense<0.000000e+00> : vector<2x32xf32>
    %22 = tpu.matmul %20, %21, %cst_11 {dimension_numbers = #tpu.dot_dimension_numbers<[1], [0], [0], [1], [0, 0, 1, 1], [], []>} : vector<2x4xf32>, vector<4x32xf32>, vector<2x32xf32> -> vector<2x32xf32>
    %c72 = arith.constant 72 : index
    %c0_12 = arith.constant 0 : index
    %23 = vector.load %arg3[%c72, %c0_12] : memref<264x128xf32, #tpu.memory_space<vmem>>, vector<1x32xf32>
    %24 = vector.broadcast %23 : vector<1x32xf32> to vector<2x32xf32>
    %25 = arith.addf %22, %24 : vector<2x32xf32>
    %26 = math.tanh %25 : vector<2x32xf32>
    %c80 = arith.constant 80 : index
    %c0_13 = arith.constant 0 : index
    %27 = vector.load %arg3[%c80, %c0_13] : memref<264x128xf32, #tpu.memory_space<vmem>>, vector<32x128xf32>
    %cst_14 = arith.constant dense<0.000000e+00> : vector<2x128xf32>
    %28 = tpu.matmul %26, %27, %cst_14 {dimension_numbers = #tpu.dot_dimension_numbers<[1], [0], [0], [1], [0, 0, 1, 1], [], []>} : vector<2x32xf32>, vector<32x128xf32>, vector<2x128xf32> -> vector<2x128xf32>
    %c112 = arith.constant 112 : index
    %c0_15 = arith.constant 0 : index
    %29 = vector.load %arg3[%c112, %c0_15] : memref<264x128xf32, #tpu.memory_space<vmem>>, vector<1x128xf32>
    %30 = vector.broadcast %29 : vector<1x128xf32> to vector<2x128xf32>
    %31 = arith.addf %28, %30 : vector<2x128xf32>
    %cst_16 = arith.constant dense<0xFF800000> : vector<2xf32>
    %32 = vector.multi_reduction <maximumf>, %31, %cst_16 [1] : vector<2x128xf32> to vector<2xf32>
    %33 = vector.shape_cast %32 : vector<2xf32> to vector<2x1xf32>
    %34 = vector.broadcast %33 : vector<2x1xf32> to vector<2x128xf32>
    %35 = arith.subf %31, %34 : vector<2x128xf32>
    %36 = math.exp %35 : vector<2x128xf32>
    %c136 = arith.constant 136 : index
    %c0_17 = arith.constant 0 : index
    %37 = vector.load %arg3[%c136, %c0_17] : memref<264x128xf32, #tpu.memory_space<vmem>>, vector<128x16xf32>
    %cst_18 = arith.constant dense<0.000000e+00> : vector<2x16xf32>
    %38 = tpu.matmul %36, %37, %cst_18 {dimension_numbers = #tpu.dot_dimension_numbers<[1], [0], [0], [1], [0, 0, 1, 1], [], []>} : vector<2x128xf32>, vector<128x16xf32>, vector<2x16xf32> -> vector<2x16xf32>
    %39 = math.log %38 : vector<2x16xf32>
    %c120 = arith.constant 120 : index
    %c0_19 = arith.constant 0 : index
    %40 = vector.load %arg3[%c120, %c0_19] : memref<264x128xf32, #tpu.memory_space<vmem>>, vector<16x128xf32>
    %cst_20 = arith.constant dense<0.000000e+00> : vector<2x128xf32>
    %41 = tpu.matmul %39, %40, %cst_20 {dimension_numbers = #tpu.dot_dimension_numbers<[1], [0], [0], [1], [0, 0, 1, 1], [], []>} : vector<2x16xf32>, vector<16x128xf32>, vector<2x128xf32> -> vector<2x128xf32>
    %42 = arith.subf %35, %41 : vector<2x128xf32>
    %cst_21 = arith.constant -34.5387764 : f32
    %cst_22 = arith.constant -9.99200722E-16 : f32
    %43 = vector.broadcast %cst_21 : f32 to vector<2x128xf32>
    %44 = arith.maximumf %43, %42 : vector<2x128xf32>
    %45 = vector.broadcast %cst_22 : f32 to vector<2x128xf32>
    %46 = arith.minimumf %45, %44 : vector<2x128xf32>
    %47 = vector.shape_cast %46 : vector<2x128xf32> to vector<1x2x128xf32>
    %cst_23 = arith.constant dense<0.000000e+00> : vector<1xf32>
    %48 = vector.multi_reduction <add>, %47, %cst_23 [1, 2] : vector<1x2x128xf32> to vector<1xf32>
    %49 = vector.shape_cast %48 : vector<1xf32> to vector<1x1x1xf32>
    %50 = vector.extract %49[0, 0, 0] : f32 from vector<1x1x1xf32>
    %cst_24 = arith.constant 2.000000e+00 : f32
    %51 = vector.broadcast %cst_24 : f32 to vector<2x4xf32>
    %52 = arith.mulf %51, %14 : vector<2x4xf32>
    %cst_25 = arith.constant 5.000000e-01 : f32
    %53 = vector.broadcast %cst_25 : f32 to vector<2x4xf32>
    %54 = arith.mulf %53, %13 : vector<2x4xf32>
    %55 = arith.mulf %54, %13 : vector<2x4xf32>
    %56 = arith.addf %52, %55 : vector<2x4xf32>
    %57 = vector.shape_cast %56 : vector<2x4xf32> to vector<1x2x4xf32>
    %cst_26 = arith.constant dense<0.000000e+00> : vector<1xf32>
    %58 = vector.multi_reduction <add>, %57, %cst_26 [1, 2] : vector<1x2x4xf32> to vector<1xf32>
    %59 = vector.shape_cast %58 : vector<1xf32> to vector<1x1x1xf32>
    %60 = vector.extract %59[0, 0, 0] : f32 from vector<1x1x1xf32>
    %cst_27 = arith.constant 5.000000e-01 : f32
    %61 = vector.broadcast %cst_27 : f32 to vector<2x4xf32>
    %62 = arith.mulf %61, %20 : vector<2x4xf32>
    %63 = arith.mulf %62, %20 : vector<2x4xf32>
    %64 = vector.shape_cast %63 : vector<2x4xf32> to vector<1x2x4xf32>
    %cst_28 = arith.constant dense<0.000000e+00> : vector<1xf32>
    %65 = vector.multi_reduction <add>, %64, %cst_28 [1, 2] : vector<1x2x4xf32> to vector<1xf32>
    %66 = vector.shape_cast %65 : vector<1xf32> to vector<1x1x1xf32>
    %67 = vector.extract %66[0, 0, 0] : f32 from vector<1x1x1xf32>
    %68 = tpu.iota {dimensions = array<i32: 2>} : vector<1x1x128xi32>
    %c0_i32 = arith.constant 0 : i32
    %69 = vector.broadcast %c0_i32 : i32 to vector<1x1x128xi32>
    %70 = arith.cmpi eq, %68, %69 : vector<1x1x128xi32>
    %cst_29 = arith.constant 0.000000e+00 : f32
    %71 = vector.broadcast %50 : f32 to vector<1x1x128xf32>
    %72 = vector.broadcast %cst_29 : f32 to vector<1x1x128xf32>
    %73 = arith.select %70, %71, %72 : vector<1x1x128xi1>, vector<1x1x128xf32>
    %c1_i32 = arith.constant 1 : i32
    %74 = vector.broadcast %c1_i32 : i32 to vector<1x1x128xi32>
    %75 = arith.cmpi eq, %68, %74 : vector<1x1x128xi32>
    %cst_30 = arith.constant 0.000000e+00 : f32
    %76 = vector.broadcast %60 : f32 to vector<1x1x128xf32>
    %77 = vector.broadcast %cst_30 : f32 to vector<1x1x128xf32>
    %78 = arith.select %75, %76, %77 : vector<1x1x128xi1>, vector<1x1x128xf32>
    %79 = arith.addf %73, %78 : vector<1x1x128xf32>
    %c2_i32 = arith.constant 2 : i32
    %80 = vector.broadcast %c2_i32 : i32 to vector<1x1x128xi32>
    %81 = arith.cmpi eq, %68, %80 : vector<1x1x128xi32>
    %cst_31 = arith.constant 0.000000e+00 : f32
    %82 = vector.broadcast %67 : f32 to vector<1x1x128xf32>
    %83 = vector.broadcast %cst_31 : f32 to vector<1x1x128xf32>
    %84 = arith.select %81, %82, %83 : vector<1x1x128xi1>, vector<1x1x128xf32>
    %85 = arith.addf %79, %84 : vector<1x1x128xf32>
    %c0_32 = arith.constant 0 : index
    %c0_33 = arith.constant 0 : index
    %c0_34 = arith.constant 0 : index
    %86 = vector.load %arg4[%c0_32, %c0_33, %c0_34] : memref<1x1x128xf32, #tpu.memory_space<vmem>>, vector<1x1x128xf32>
    tpu.vector_store %arg4[%c0_32, %c0_33, %c0_34], %85 {strides = array<i32>} : memref<1x1x128xf32, #tpu.memory_space<vmem>>, vector<1x1x128xf32>,
    return
  }
  func.func @transform_0(%arg0: i32) -> (i32, i32) {
    %c0_i32 = arith.constant 0 : i32
    %c0_i32_0 = arith.constant 0 : i32
    return %arg0, %c0_i32 : i32, i32
  }
  func.func @transform_1(%arg0: i32) -> (i32, i32) {
    %c0_i32 = arith.constant 0 : i32
    %c0_i32_0 = arith.constant 0 : i32
    return %arg0, %c0_i32 : i32, i32
  }
  func.func @transform_2(%arg0: i32) -> (i32, i32) {
    %c0_i32 = arith.constant 0 : i32
    %c0_i32_0 = arith.constant 0 : i32
    %c0_i32_1 = arith.constant 0 : i32
    return %c0_i32, %c0_i32_0 : i32, i32
  }
  func.func @transform_3(%arg0: i32) -> (i32, i32, i32) {
    %c0_i32 = arith.constant 0 : i32
    %c0_i32_0 = arith.constant 0 : i32
    %c0_i32_1 = arith.constant 0 : i32
    return %arg0, %c0_i32, %c0_i32_0 : i32, i32, i32
  }
}

</mosaic_0001>

<bundles_post_ra>
// kernel: vae_forward.1
= control target key start
LH: loop header
LB: loop body
LE: loop exit
PB: predicated region body
PF: predicated region fallthrough
CT: control target
= control target key end

     0   :  { %8 = vsyncpa [#allocation3], 0  ;;  %s496_s0 = inlined_call_operand.hbm [shape: s32[2,16], index: 0, kind: input, shape index: {}]   ;;  %s497_s1 = inlined_call_operand.hbm [shape: f32[2,4], index: 1, kind: input, shape index: {}]   ;;  %s498_s2 = inlined_call_operand.hbm [shape: f32[264,128], index: 2, kind: input, shape index: {}]   ;;  %s499_s3 = inlined_call_operand.vmem [shape: f32[1,1,128], index: 3, kind: output, shape index: {}]  }
   0x1   :  { %9 = vsyncpa [#allocation5], 0  ;;  %s26_s14 = sshll.u32 %s497_s1, 4  ;;  %s439_s15 = smov [#allocation4]   ;;  %s27_s14 = int_to_ptr.hbm [resolvable:$true] %s26_s14 }
   0x2   :  { %s28_s16 = sshll.u32 %s439_s15, 4  ;;  %s15_s19 = sshll.u32 %s496_s0, 4  ;;  %s29_s16 = int_to_ptr.vmem [resolvable:$true] %s28_s16  ;;  %s16_s19 = int_to_ptr.hbm [resolvable:$true] %s15_s19 }
   0x3   :  { %31 = dma.hbm_to_vmem [thread:$0]  %s27_s14, 32, %s29_s16, [#allocation5]  }
   0x4   :  { %s440_s20 = smov [#allocation2]   ;;  %s36_s24 = sshll.u32 %s498_s2, 4  ;;  %s37_s24 = int_to_ptr.hbm [resolvable:$true] %s36_s24 }
   0x5   :  { %s17_s21 = sshll.u32 %s440_s20, 4  ;;  %s441_s1 = smov [#allocation6]   ;;  %s18_s21 = int_to_ptr.vmem [resolvable:$true] %s17_s21 }
   0x6   :  { %20 = dma.hbm_to_vmem [thread:$0]  %s16_s19, 32, %s18_s21, [#allocation3]  }
   0x7   :  { %s38_s25 = sshll.u32 %s441_s1, 4  ;;  %s442_s26 = smov 128   ;;  %s39_s25 = int_to_ptr.vmem [resolvable:$true] %s38_s25 }
   0x8   :  { %s443_s27 = smov 8  }
   0x9   :  { %44 = dma.hbm_to_vmem [thread:$0]  %s37_s24, 4224, %s39_s25, [#allocation5], %s442_s26, %s442_s26, %s443_s27  }
   0xa   :  { %435 = dma.done.wait [#allocation3], 32  }
   0xb   :  { %436 = vsyncadd [#allocation3], 4294967264 }
   0xc   :  { %437 = dma.done.wait [#allocation5], 4256  }
   0xd   :  { %438 = vsyncadd [#allocation5], 4294963040  ;;  %v60_v0 = vld [vmem:[#allocation6 + $0x8] sm:$0xff]  ;;  %v59_v1 = vld [vmem:[#allocation6] sm:$0xff]  ;;  %vm63_vm0 = vcmask 130048   ;;  %s444_s0 = smov 4  }
   0xe   :  { %v57_v2 = vld [vmem:[#allocation2] sm:$0x3]  ;;  %81 = vmatpush.msra.mxu0 %v60_v0  ;;  %v91_v4 = vld [vmem:[#allocation6 + $0x30] sm:$0xff]  ;;  %v90_v5 = vld [vmem:[#allocation6 + $0x28] sm:$0xff]  ;;  %vm94_vm1 = vcmask 261120   ;;  %vm139_vm2 = vcmask 1043456  }
   0xf   :  { %v58_v3 = vcvt.s32.f32 %v57_v2  ;;  %110 = vmatpush.msra.mxu1 %v91_v4  ;;  %v89_v6 = vld [vmem:[#allocation6 + $0x20] sm:$0xff]  ;;  %v88_v7 = vld [vmem:[#allocation6 + $0x18] sm:$0xff]  ;;  %v349_v9 = vld [vmem:[#allocation6 + $0x10] ss:$0 sm:$0xff]  ;;  %s445_s2 = smov 124   ;;  %vm135_vm3 = vcmask 31744  }
  0x10   :  { %82 = vmatpush.msra.mxu0 %v59_v1  ;;  %v121_v8 = vld [vmem:[#allocation4] sm:$0x3]  ;;  %v132_v13 = vld [vmem:[#allocation6 + $0x40] sm:$0xf]  ;;  %v350_v14 = vld [vmem:[#allocation6 + $0x38] ss:$0 sm:$0xff] }
  0x11   :  { %330 = vmatmul.msk.f32.vlgmr.msra.gmra.mxu0 %vm63_vm0, %v58_v3  ;;  %111 = vmatpush.msra.mxu1 %v90_v5  ;;  %v167_v24 = vld [vmem:[#allocation6 + $0x68] sm:$0xff]  ;;  %v166_v25 = vld [vmem:[#allocation6 + $0x60] sm:$0xff]  ;;  %v165_v26 = vld [vmem:[#allocation6 + $0x58] sm:$0xff]  ;;  %vm193_vm4 = vcmask 1041408   ;;  %vm287_vm5 = vcmask 25600  }
  0x12   :  { %123 = vrot.lane.b32.xlu0 %v121_v8, %s444_s0  ;;  %185 = vmatpush.msra.mxu3 %v167_v24  ;;  %v164_v27 = vld [vmem:[#allocation6 + $0x50] sm:$0xff]  ;;  %v351_v28 = vld [vmem:[#allocation6 + $0x48] ss:$0 sm:$0xff]  ;;  %v215_v37 = vld [vmem:[#allocation6 + $0x100] sm:$0xff] }
  0x13   :  { %112 = vmatpush.msra.mxu1 %v89_v6  ;;  %v352_v32 = vld [vmem:[#allocation6 + $0x70] ss:$0 sm:$0xff]  ;;  %v214_v38 = vld [vmem:[#allocation6 + $0xf8] sm:$0xff]  ;;  %216 = vmatpush.msra.mxu2 %v215_v37  ;;  %v212_v40 = vld [vmem:[#allocation6 + $0xe8] sm:$0xff] }
  0x14   :  { %186 = vmatpush.msra.mxu3 %v166_v25  ;;  %v213_v39 = vld [vmem:[#allocation6 + $0xf0] sm:$0xff]  ;;  %v211_v41 = vld [vmem:[#allocation6 + $0xe0] sm:$0xff]  ;;  %v210_v42 = vld [vmem:[#allocation6 + $0xd8] sm:$0xff] }
  0x15   :  { %113 = vmatpush.msra.mxu1 %v88_v7  ;;  %217 = vmatpush.msra.mxu2 %v214_v38  ;;  %v209_v43 = vld [vmem:[#allocation6 + $0xd0] sm:$0xff]  ;;  %v208_v44 = vld [vmem:[#allocation6 + $0xc8] sm:$0xff]  ;;  %v207_v45 = vld [vmem:[#allocation6 + $0xc0] sm:$0xff] }
  0x16   :  { %187 = vmatpush.msra.mxu3 %v165_v26  ;;  %v206_v46 = vld [vmem:[#allocation6 + $0xb8] sm:$0xff]  ;;  %v205_v50 = vld [vmem:[#allocation6 + $0xb0] sm:$0xff]  ;;  %v204_v51 = vld [vmem:[#allocation6 + $0xa8] sm:$0xff] }
  0x17   :  { %332 = vmatpush.msk.msrb.mxu1 %vm139_vm2, %v132_v13  ;;  %218 = vmatpush.msra.mxu2 %v213_v39  ;;  %v203_v52 = vld [vmem:[#allocation6 + $0xa0] sm:$0xff]  ;;  %v202_v53 = vld [vmem:[#allocation6 + $0x98] sm:$0xff]  ;;  %v201_v54 = vld [vmem:[#allocation6 + $0x90] sm:$0xff] }
  0x18   :  { %188 = vmatpush.msra.mxu3 %v164_v27  ;;  %v200_v55 = vld [vmem:[#allocation6 + $0x88] sm:$0xff]  ;;  %v239_v0 = vld [vmem:[#allocation6 + $0x80] sm:$0xff]  ;;  %v238_v2 = vld [vmem:[#allocation6 + $0x78] sm:$0xff] }
  0x19   :  { %219 = vmatpush.msra.mxu2 %v212_v40  ;;  %257 = vmatpush.msrb.mxu0 %v239_v0 }
  0x1b   :  { %220 = vmatpush.msra.mxu2 %v211_v41  ;;  %258 = vmatpush.msrb.mxu0 %v238_v2 }
  0x1d   :  { %221 = vmatpush.msra.mxu2 %v210_v42 }
  0x1f   :  { %222 = vmatpush.msra.mxu2 %v209_v43 }
  0x21   :  { %223 = vmatpush.msra.mxu2 %v208_v44 }
  0x23   :  { %224 = vmatpush.msra.mxu2 %v207_v45 }
  0x25   :  { %225 = vmatpush.msra.mxu2 %v206_v46 }
  0x27   :  { %226 = vmatpush.msra.mxu2 %v205_v50 }
  0x29   :  { %227 = vmatpush.msra.mxu2 %v204_v51 }
  0x2b   :  { %228 = vmatpush.msra.mxu2 %v203_v52 }
  0x2d   :  { %229 = vmatpush.msra.mxu2 %v202_v53 }
  0x2f   :  { %230 = vmatpush.msra.mxu2 %v201_v54 }
  0x31   :  { %231 = vmatpush.msra.mxu2 %v200_v55 }
  0x84   :  { %v124_v19 = vpop.permute.xlu0 %123 }
  0x8e   :  { %v84_v10 = vpop.f32.mrf.mxu0 }
  0x8f   :  { %v85_v11 = vadd.f32 %v349_v9, %v84_v10 }
  0x91   :  { %353 = vtanh.f32 %v85_v11 }
  0x97   :  { %v354_v12 = vpop.eup %353 }
  0x98   :  { %331 = vmatmul.msk.f32.vlgmr.msra.gmra.mxu1 %vm94_vm1, %v354_v12 }
 0x115   :  { %v115_v15 = vpop.f32.mrf.mxu1 }
 0x116   :  { %v478_v16 = vadd.f32 %v350_v14, %v115_v15 }
 0x118   :  { %v118_v17 = vmul.f32 0.5, %v478_v16  ;;  %v276_v60 = vmul.f32 2.0, %v478_v16 }
 0x11a   :  { %v119_v18 = vmul.f32 1.442695, %v118_v17  ;;  %v277_v36 = vmul.f32 %v118_v17, %v478_v16 }
 0x11c   :  { %355 = vpow2.f32 %v119_v18 }
 0x122   :  { %v356_v20 = vpop.eup %355 }
 0x123   :  { %v126_v21 = vmul.f32 %v356_v20, %v124_v19 }
 0x125   :  { %128 = vrot.lane.b32.xlu0 %v126_v21, %s445_s2 }
 0x197   :  { %v129_v22 = vpop.permute.xlu0 %128 }
 0x198   :  { %v131_v23 = vadd.f32 %v129_v22, %v478_v16 }
 0x19a   :  { %333 = vmatmul.msk.f32.vlgmr.msrb.gmra.mxu1 %vm135_vm3, %v131_v23  ;;  %v298_v47 = vmul.f32 0.5, %v131_v23 }
 0x19c   :  { %v299_v48 = vmul.f32 %v298_v47, %v131_v23 }
 0x19e   :  { %v300_v49 = vsel %vm287_vm5, %v299_v48, 0.0 }
 0x217   :  { %v160_v29 = vpop.f32.mrf.mxu1 }
 0x218   :  { %v161_v30 = vadd.f32 %v351_v28, %v160_v29 }
 0x21a   :  { %357 = vtanh.f32 %v161_v30 }
 0x220   :  { %v358_v31 = vpop.eup %357 }
 0x221   :  { %334 = vmatmul.msk.f32.vlgmr.msra.gmra.mxu3 %vm94_vm1, %v358_v31 }
 0x2a4   :  { %v190_v33 = vpop.f32.mrf.mxu3 }
 0x2a5   :  { %v191_v34 = vadd.f32 %v352_v32, %v190_v33  ;;  %v310_v32 = vlaneseq }
 0x2a7   :  { %v194_v35 = vsel %vm193_vm4, %v191_v34, -inf  ;;  %v311_v33 = vand.u32 127, %v310_v32 }
 0x2a8   :  { %195 = vmax.xlane.f32.xlu1 %v194_v35 }
 0x2a9   :  { %vm312_vm6 = vcmp.eq.s32.totalorder %v311_v33, 0  ;;  %vm315_vm7 = vcmp.eq.s32.totalorder %v311_v33, 1  ;;  %vm319_vm8 = vcmp.eq.s32.totalorder %v311_v33, 2 }
 0x2c1   :  { %279 = vrot.lane.b32.xlu1 %v277_v36, %s444_s0 }
 0x2eb   :  { %301 = vadd.xlane.f32.xlu1 %v300_v49 }
 0x31b   :  { %v196_v56 = vpop.xlane.xlu1 %195 }
 0x31c   :  { %v197_v57 = vsub.f32 %v191_v34, %v196_v56 }
 0x31e   :  { %v198_v58 = vmul.f32 1.442695, %v197_v57 }
 0x320   :  { %359 = vpow2.f32 %v198_v58 }
 0x326   :  { %v360_v59 = vpop.eup %359 }
 0x327   :  { %232 = vmatmul.f32.vlgmr.msra.gmra.mxu2 %v360_v59 }
 0x333   :  { %v280_v61 = vpop.permute.xlu1 %279 }
 0x334   :  { %v282_v62 = vadd.f32 %v280_v61, %v276_v60 }
 0x336   :  { %284 = vrot.lane.b32.xlu2 %v282_v62, %s445_s2 }
 0x35e   :  { %v302_v12 = vpop.xlane.xlu1 %301 }
 0x35f   :  { %v303_v14 = vrot.slane %v302_v12, 4 }
 0x361   :  { %v304_v16 = vadd.f32 %v303_v14, %v302_v12 }
 0x363   :  { %v305_v19 = vrot.slane %v304_v16, 2 }
 0x365   :  { %v306_v23 = vadd.f32 %v305_v19, %v304_v16 }
 0x367   :  { %v307_v28 = vrot.slane %v306_v23, 1 }
 0x369   :  { %v308_v31 = vadd.f32 %v307_v28, %v306_v23 }
 0x390   :  { %v285_v63 = vpop.permute.xlu2 %284 }
 0x391   :  { %v288_v1 = vsel %vm287_vm5, %v285_v63, 0.0 }
 0x392   :  { %289 = vadd.xlane.f32.xlu0 %v288_v1 }
 0x3aa   :  { %v233_v3 = vpop.f32.mrf.mxu2 }
 0x3ab   :  { %361 = vlog2.f32 %v233_v3 }
 0x3b1   :  { %v362_v4 = vpop.eup %361 }
 0x3b2   :  { %v237_v5 = vmul.f32 0.6931472, %v362_v4 }
 0x3b4   :  { %335 = vmatmul.msk.f32.vlgmr.msrb.gmra.mxu0 %vm63_vm0, %v237_v5 }
 0x405   :  { %v290_v11 = vpop.xlane.xlu0 %289 }
 0x406   :  { %v291_v13 = vrot.slane %v290_v11, 4 }
 0x408   :  { %v292_v15 = vadd.f32 %v291_v13, %v290_v11 }
 0x40a   :  { %v293_v17 = vrot.slane %v292_v15, 2 }
 0x40c   :  { %v294_v22 = vadd.f32 %v293_v17, %v292_v15 }
 0x40e   :  { %v295_v26 = vrot.slane %v294_v22, 1 }
 0x410   :  { %v296_v30 = vadd.f32 %v295_v26, %v294_v22 }
 0x431   :  { %v260_v6 = vpop.f32.mrf.mxu0 }
 0x432   :  { %v263_v7 = vsub.f32 %v197_v57, %v260_v6 }
 0x434   :  { %v264_v8 = vmax.f32 %v263_v7, -34.538776 }
 0x436   :  { %v265_v9 = vmin.f32 %v264_v8, -9.992007e-16 }
 0x438   :  { %v266_v10 = vsel %vm193_vm4, %v265_v9, 0.0 }
 0x439   :  { %267 = vadd.xlane.f32.xlu2 %v266_v10 }
 0x4ac   :  { %v268_v18 = vpop.xlane.xlu2 %267 }
 0x4ad   :  { %v269_v20 = vrot.slane %v268_v18, 4 }
 0x4af   :  { %v270_v21 = vadd.f32 %v269_v20, %v268_v18 }
 0x4b1   :  { %v271_v24 = vrot.slane %v270_v21, 2 }
 0x4b3   :  { %v272_v25 = vadd.f32 %v271_v24, %v270_v21 }
 0x4b5   :  { %v273_v27 = vrot.slane %v272_v25, 1 }
 0x4b7   :  { %v274_v29 = vadd.f32 %v273_v27, %v272_v25 }
 0x4b9   :  { %336 = vpush %v274_v29 }
 0x4ba   :  { %338 = vpush %v296_v30 }
 0x4bb   :  { %340 = vpush %v308_v31 }
 0x4ea   :  { %s337_s28 = spop %336 }
 0x4eb   :  { %v313_v34 = vstv %s337_s28  ;;  %s339_s29 = spop %338 }
 0x4ec   :  { %v314_v35 = vsel %vm312_vm6, %v313_v34, 0.0  ;;  %v316_v36 = vstv %s339_s29  ;;  %s341_s30 = spop %340 }
 0x4ed   :  { %v317_v37 = vsel %vm315_vm7, %v316_v36, 0.0  ;;  %v320_v38 = vstv %s341_s30 }
 0x4ee   :  { %v318_v39 = vadd.f32 %v317_v37, %v314_v35  ;;  %v321_v40 = vsel %vm319_vm8, %v320_v38, 0.0 }
 0x4f0   :  { %v322_v41 = vadd.f32 %v321_v40, %v318_v39 }
 0x4f2   :  { %323 = vst [vmem:[%s499_s3] sm:$0x1] %v322_v41 }
 0x4f3   :  { %328 = vsyncpa [#allocation3], 1 }
 0x4f4   :  { %329 = vsyncpa [#allocation5], 1 }

</bundles_post_ra>
